<compile_context>
chip_gen: v7x
topology: tpu7x:2x2x1
jax: 0.10.0
libtpu: 0.0.40
codegen_flags: <defaults>
</compile_context>

<pallas_src>
import functools

import jax
import jax.numpy as jnp
from jax.experimental import pallas as pl
from jax.experimental.pallas import tpu as pltpu


# ----------------------------- Pallas kernel -----------------------------

def _channel_attention_kernel(x_ref, w1_ref, w2_ref, o_ref, sum_ref, max_ref, *,
                              hw_tile, num_hw_tiles, inv_hw):
    # x_ref : (1, C, T)   current HW tile of this batch element (native dtype)
    # w1_ref: (Cr, C)     fc1 weight (1x1 conv, no bias), f32
    # w2_ref: (C, Cr)     fc2 weight (1x1 conv, no bias), f32
    # o_ref : (1, C, HW)  resident output block for this batch element
    # sum_ref / max_ref: (C, 1) f32 carried pooling accumulators
    t = pl.program_id(1)

    @pl.when(t == 0)
    def _init():
        sum_ref[...] = jnp.zeros_like(sum_ref)
        max_ref[...] = jnp.full(max_ref.shape, -jnp.inf, dtype=max_ref.dtype)

    tile = x_ref[0]                                                     # (C, T)
    sum_ref[...] += jnp.sum(tile.astype(jnp.float32), axis=1, keepdims=True)
    max_ref[...] = jnp.maximum(
        max_ref[...], jnp.max(tile, axis=1, keepdims=True).astype(jnp.float32))

    # Stream the raw tile into the resident output block (x read from HBM only once).
    if num_hw_tiles == 1:
        o_ref[0] = tile
    else:
        start = pl.multiple_of(t * hw_tile, 128)
        o_ref[0, :, pl.ds(start, hw_tile)] = tile

    @pl.when(t == num_hw_tiles - 1)
    def _finalize():
        avg = sum_ref[...] * inv_hw                                     # (C, 1) AdaptiveAvgPool2d(1)
        pooled = jnp.concatenate([avg, max_ref[...]], axis=1)           # (C, 2) both branches share fc
        h = jnp.dot(w1_ref[...], pooled,
                    preferred_element_type=jnp.float32)                 # (Cr, 2) 1x1 conv #1
        h = h * jax.nn.sigmoid(h)                                       # SiLU
        y = jnp.dot(w2_ref[...], h,
                    preferred_element_type=jnp.float32)                 # (C, 2)  1x1 conv #2
        scale = jax.nn.sigmoid(y[:, 0:1] + y[:, 1:2])                   # (C, 1)  sigmoid(avg_out + max_out)
        # per-sublane broadcast over the lane (HW) axis; in-place scale of resident block
        o_ref[0] = (o_ref[0] * scale).astype(o_ref.dtype)


# ----------------------------- wrapper -----------------------------

def _pick_hw_tile(hw, target=2048):
    """Largest lane-aligned tile <= target that divides hw (or full hw)."""
    if hw % 128 != 0 or hw <= target:
        return hw
    t = (target // 128) * 128
    while hw % t:
        t -= 128
    return t


def channel_attention_forward(x, fc1_w, fc2_w, *, hw_tile=None, donate_x=False):
    """x: (B, C, H, W); fc1_w: (C//sf, C, 1, 1); fc2_w: (C, C//sf, 1, 1).

    Output dtype/layout follow x (bf16 in -> bf16 out; NCHW in -> NCHW out, no transposes).
    """
    B, C, H, W = x.shape
    Cr = fc1_w.shape[0]
    HW = H * W

    x3 = x.reshape(B, C, HW)                            # free: contiguous view, no data movement
    w1 = fc1_w.reshape(Cr, C).astype(jnp.float32)       # (Cr, C)
    w2 = fc2_w.reshape(C, Cr).astype(jnp.float32)       # (C, Cr)

    T = _pick_hw_tile(HW) if hw_tile is None else int(hw_tile)
    if T != HW:
        assert HW % T == 0 and T % 128 == 0, "hw_tile must divide H*W and be lane-aligned"
    n_t = HW // T

    itemsize = jnp.dtype(x.dtype).itemsize
    est_vmem = (2 * C * HW * itemsize                   # resident output block (double buffered)
                + 2 * C * T * itemsize                  # streamed input tile (double buffered)
                + 2 * C * Cr * 4 + 8 * C * 4)           # weights + pooling scratch
    vmem_limit = int(min(max(2 * est_vmem, 16 << 20), 64 << 20))   # cap at v7x physical VMEM

    kernel = functools.partial(_channel_attention_kernel,
                               hw_tile=T, num_hw_tiles=n_t, inv_hw=1.0 / HW)

    out = pl.pallas_call(
        kernel,
        out_shape=jax.ShapeDtypeStruct((B, C, HW), x.dtype),
        grid=(B, n_t),
        in_specs=[pl.BlockSpec((1, C, T), lambda b, t: (b, 0, t)),
                  pl.BlockSpec((Cr, C), lambda b, t: (0, 0)),
                  pl.BlockSpec((C, Cr), lambda b, t: (0, 0))],
        out_specs=pl.BlockSpec((1, C, HW), lambda b, t: (b, 0, 0)),
        scratch_shapes=[pltpu.VMEM((C, 1), jnp.float32),   # running sum
                        pltpu.VMEM((C, 1), jnp.float32)],  # running max
        compiler_params=pltpu.CompilerParams(
            dimension_semantics=("parallel", "arbitrary"),
            vmem_limit_bytes=vmem_limit),
        input_output_aliases=({0: 0} if donate_x else {}),
    )(x3, w1, w2)

    return out.reshape(B, C, H, W)


# --------------------------- pure-JAX reference ---------------------------

def ref_forward(x, fc1_w, fc2_w):
    B, C, H, W = x.shape
    Cr = fc1_w.shape[0]
    w1 = fc1_w.reshape(Cr, C)
    w2 = fc2_w.reshape(C, Cr)
    xf = x.astype(jnp.float32)

    avg = jnp.mean(xf, axis=(2, 3))                     # (B, C)
    mx = jnp.max(xf, axis=(2, 3))                       # (B, C)

    def fc(v):
        h = v @ w1.T
        h = h * jax.nn.sigmoid(h)                       # SiLU
        return h @ w2.T

    scale = jax.nn.sigmoid(fc(avg) + fc(mx))            # (B, C)
    return xf * scale[:, :, None, None]


# ----------------------------------- main -----------------------------------

if __name__ == "__main__":
    # num_feat must be >= squeeze_factor; small but faithful sizes
    num_feat, squeeze_factor = 64, 16
    Cr = num_feat // squeeze_factor                      # 4
    B, H, W = 2, 16, 16                                  # HW = 256 (lane-dense)

    key = jax.random.PRNGKey(0)
    k_x, k_w1, k_w2 = jax.random.split(key, 3)

    x = jax.random.normal(k_x, (B, num_feat, H, W), jnp.float32)
    fc1_w = (0.1 * jax.random.normal(k_w1, (Cr, num_feat, 1, 1))).astype(jnp.float32)
    fc2_w = (0.1 * jax.random.normal(k_w2, (num_feat, Cr, 1, 1))).astype(jnp.float32)

    ref = ref_forward(x, fc1_w, fc2_w)

    # single-tile path (HW fits one lane-dense block)
    out1 = jax.block_until_ready(channel_attention_forward(x, fc1_w, fc2_w))
    # streamed / tiled path (2 HW tiles -> exercises carried sum/max + in-place scale)
    out2 = jax.block_until_ready(channel_attention_forward(x, fc1_w, fc2_w, hw_tile=128))

    for out in (out1, out2):
        assert out.shape == (B, num_feat, H, W)
        assert bool(jnp.all(jnp.isfinite(out)))
        assert bool(jnp.allclose(out, ref, atol=1e-2, rtol=1e-2)), \
            f"max abs diff {float(jnp.max(jnp.abs(out - ref)))}"
    print("KERNEL_OK")
</pallas_src>

<mosaic_0001>
module attributes {stable_mosaic.version = 11 : i64} {
  func.func @_channel_attention_kernel(%arg0: i32, %arg1: i32, %arg2: memref<1x64x256xf32, #tpu.memory_space<vmem>>, %arg3: memref<4x64xf32, #tpu.memory_space<vmem>>, %arg4: memref<64x4xf32, #tpu.memory_space<vmem>>, %arg5: memref<1x64x256xf32, #tpu.memory_space<vmem>>, %arg6: memref<64x1xf32, #tpu.memory_space<vmem>>, %arg7: memref<64x1xf32, #tpu.memory_space<vmem>>) attributes {dimension_semantics = [#tpu.dimension_semantics<parallel>, #tpu.dimension_semantics<arbitrary>], iteration_bounds = array<i64: 2, 1>, scalar_prefetch = 0 : i64, scratch_operands = 2 : i64, tpu.core_type = #tpu.core_type<tc>, window_params = [{transform_indices = @transform_0, window_bounds = array<i64: 1, 64, 256>}, {pipeline_mode = #tpu.pipeline_mode<synchronous>, transform_indices = @transform_1, window_bounds = array<i64: 4, 64>}, {pipeline_mode = #tpu.pipeline_mode<synchronous>, transform_indices = @transform_2, window_bounds = array<i64: 64, 4>}, {transform_indices = @transform_3, window_bounds = array<i64: 1, 64, 256>}]} {
    %c0_i32 = arith.constant 0 : i32
    %0 = arith.cmpi eq, %arg1, %c0_i32 : i32
    %1 = arith.extui %0 : i1 to i32
    %c0_i32_0 = arith.constant 0 : i32
    %2 = arith.cmpi ne, %1, %c0_i32_0 : i32
    scf.if %2 {
      %cst_17 = arith.constant 0.000000e+00 : f32
      %21 = vector.broadcast %cst_17 : f32 to vector<64x1xf32>
      %c0_18 = arith.constant 0 : index
      %c0_19 = arith.constant 0 : index
      %22 = vector.load %arg6[%c0_18, %c0_19] : memref<64x1xf32, #tpu.memory_space<vmem>>, vector<64x1xf32>
      tpu.vector_store %arg6[%c0_18, %c0_19], %21 {strides = array<i32>} : memref<64x1xf32, #tpu.memory_space<vmem>>, vector<64x1xf32>,
      %cst_20 = arith.constant 0xFF800000 : f32
      %23 = vector.broadcast %cst_20 : f32 to vector<64x1xf32>
      %c0_21 = arith.constant 0 : index
      %c0_22 = arith.constant 0 : index
      %24 = vector.load %arg7[%c0_21, %c0_22] : memref<64x1xf32, #tpu.memory_space<vmem>>, vector<64x1xf32>
      tpu.vector_store %arg7[%c0_21, %c0_22], %23 {strides = array<i32>} : memref<64x1xf32, #tpu.memory_space<vmem>>, vector<64x1xf32>,
    } else {
    }
    %c0 = arith.constant 0 : index
    %c0_1 = arith.constant 0 : index
    %c0_2 = arith.constant 0 : index
    %3 = vector.load %arg2[%c0, %c0_1, %c0_2] : memref<1x64x256xf32, #tpu.memory_space<vmem>>, vector<1x64x256xf32>
    %4 = vector.shape_cast %3 : vector<1x64x256xf32> to vector<64x256xf32>
    %c0_3 = arith.constant 0 : index
    %c0_4 = arith.constant 0 : index
    %5 = vector.load %arg6[%c0_3, %c0_4] : memref<64x1xf32, #tpu.memory_space<vmem>>, vector<64x1xf32>
    %cst = arith.constant dense<0.000000e+00> : vector<64xf32>
    %6 = vector.multi_reduction <add>, %4, %cst [1] : vector<64x256xf32> to vector<64xf32>
    %7 = vector.shape_cast %6 : vector<64xf32> to vector<64x1xf32>
    %8 = arith.addf %5, %7 : vector<64x1xf32>
    %c0_5 = arith.constant 0 : index
    %c0_6 = arith.constant 0 : index
    %9 = vector.load %arg6[%c0_5, %c0_6] : memref<64x1xf32, #tpu.memory_space<vmem>>, vector<64x1xf32>
    tpu.vector_store %arg6[%c0_5, %c0_6], %8 {strides = array<i32>} : memref<64x1xf32, #tpu.memory_space<vmem>>, vector<64x1xf32>,
    %c0_7 = arith.constant 0 : index
    %c0_8 = arith.constant 0 : index
    %10 = vector.load %arg7[%c0_7, %c0_8] : memref<64x1xf32, #tpu.memory_space<vmem>>, vector<64x1xf32>
    %cst_9 = arith.constant dense<0xFF800000> : vector<64xf32>
    %11 = vector.multi_reduction <maximumf>, %4, %cst_9 [1] : vector<64x256xf32> to vector<64xf32>
    %12 = vector.shape_cast %11 : vector<64xf32> to vector<64x1xf32>
    %13 = arith.maximumf %10, %12 : vector<64x1xf32>
    %c0_10 = arith.constant 0 : index
    %c0_11 = arith.constant 0 : index
    %14 = vector.load %arg7[%c0_10, %c0_11] : memref<64x1xf32, #tpu.memory_space<vmem>>, vector<64x1xf32>
    tpu.vector_store %arg7[%c0_10, %c0_11], %13 {strides = array<i32>} : memref<64x1xf32, #tpu.memory_space<vmem>>, vector<64x1xf32>,
    %c0_12 = arith.constant 0 : index
    %c0_13 = arith.constant 0 : index
    %c0_14 = arith.constant 0 : index
    %15 = vector.load %arg5[%c0_12, %c0_13, %c0_14] : memref<1x64x256xf32, #tpu.memory_space<vmem>>, vector<1x64x256xf32>
    %16 = vector.shape_cast %15 : vector<1x64x256xf32> to vector<64x256xf32>
    %17 = vector.shape_cast %4 : vector<64x256xf32> to vector<1x64x256xf32>
    tpu.vector_store %arg5[%c0_12, %c0_13, %c0_14], %17 {strides = array<i32>} : memref<1x64x256xf32, #tpu.memory_space<vmem>>, vector<1x64x256xf32>,
    %c0_i32_15 = arith.constant 0 : i32
    %18 = arith.cmpi eq, %arg1, %c0_i32_15 : i32
    %19 = arith.extui %18 : i1 to i32
    %c0_i32_16 = arith.constant 0 : i32
    %20 = arith.cmpi ne, %19, %c0_i32_16 : i32
    scf.if %20 {
      %c0_17 = arith.constant 0 : index
      %c0_18 = arith.constant 0 : index
      %21 = vector.load %arg6[%c0_17, %c0_18] : memref<64x1xf32, #tpu.memory_space<vmem>>, vector<64x1xf32>
      %cst_19 = arith.constant 3.906250e-03 : f32
      %22 = vector.broadcast %cst_19 : f32 to vector<64x1xf32>
      %23 = arith.mulf %21, %22 : vector<64x1xf32>
      %c0_20 = arith.constant 0 : index
      %c0_21 = arith.constant 0 : index
      %24 = vector.load %arg7[%c0_20, %c0_21] : memref<64x1xf32, #tpu.memory_space<vmem>>, vector<64x1xf32>
      %25 = tpu.concatenate %23, %24 in 1 : vector<64x1xf32>, vector<64x1xf32> -> vector<64x2xf32>
      %c0_22 = arith.constant 0 : index
      %c0_23 = arith.constant 0 : index
      %26 = vector.load %arg3[%c0_22, %c0_23] : memref<4x64xf32, #tpu.memory_space<vmem>>, vector<4x64xf32>
      %cst_24 = arith.constant dense<0.000000e+00> : vector<4x2xf32>
      %27 = tpu.matmul %26, %25, %cst_24 {dimension_numbers = #tpu.dot_dimension_numbers<[1], [0], [0], [1], [0, 0, 1, 1], [], []>} : vector<4x64xf32>, vector<64x2xf32>, vector<4x2xf32> -> vector<4x2xf32>
      %28 = arith.negf %27 : vector<4x2xf32>
      %29 = math.exp %28 : vector<4x2xf32>
      %cst_25 = arith.constant 1.000000e+00 : f32
      %30 = vector.broadcast %cst_25 : f32 to vector<4x2xf32>
      %31 = arith.addf %30, %29 : vector<4x2xf32>
      %32 = arith.divf %30, %31 : vector<4x2xf32>
      %33 = arith.mulf %27, %32 : vector<4x2xf32>
      %c0_26 = arith.constant 0 : index
      %c0_27 = arith.constant 0 : index
      %34 = vector.load %arg4[%c0_26, %c0_27] : memref<64x4xf32, #tpu.memory_space<vmem>>, vector<64x4xf32>
      %cst_28 = arith.constant dense<0.000000e+00> : vector<64x2xf32>
      %35 = tpu.matmul %34, %33, %cst_28 {dimension_numbers = #tpu.dot_dimension_numbers<[1], [0], [0], [1], [0, 0, 1, 1], [], []>} : vector<64x4xf32>, vector<4x2xf32>, vector<64x2xf32> -> vector<64x2xf32>
      %36 = vector.extract_strided_slice %35 {offsets = [0, 0], sizes = [64, 1], strides = [1, 1]} : vector<64x2xf32> to vector<64x1xf32>
      %37 = vector.extract_strided_slice %35 {offsets = [0, 1], sizes = [64, 1], strides = [1, 1]} : vector<64x2xf32> to vector<64x1xf32>
      %38 = arith.addf %36, %37 : vector<64x1xf32>
      %39 = arith.negf %38 : vector<64x1xf32>
      %40 = math.exp %39 : vector<64x1xf32>
      %cst_29 = arith.constant 1.000000e+00 : f32
      %41 = vector.broadcast %cst_29 : f32 to vector<64x1xf32>
      %42 = arith.addf %41, %40 : vector<64x1xf32>
      %43 = arith.divf %41, %42 : vector<64x1xf32>
      %c0_30 = arith.constant 0 : index
      %c0_31 = arith.constant 0 : index
      %c0_32 = arith.constant 0 : index
      %44 = vector.load %arg5[%c0_30, %c0_31, %c0_32] : memref<1x64x256xf32, #tpu.memory_space<vmem>>, vector<1x64x256xf32>
      %45 = vector.shape_cast %44 : vector<1x64x256xf32> to vector<64x256xf32>
      %46 = vector.broadcast %43 : vector<64x1xf32> to vector<64x256xf32>
      %47 = arith.mulf %45, %46 : vector<64x256xf32>
      %c0_33 = arith.constant 0 : index
      %c0_34 = arith.constant 0 : index
      %c0_35 = arith.constant 0 : index
      %48 = vector.load %arg5[%c0_33, %c0_34, %c0_35] : memref<1x64x256xf32, #tpu.memory_space<vmem>>, vector<1x64x256xf32>
      %49 = vector.shape_cast %48 : vector<1x64x256xf32> to vector<64x256xf32>
      %50 = vector.shape_cast %47 : vector<64x256xf32> to vector<1x64x256xf32>
      tpu.vector_store %arg5[%c0_33, %c0_34, %c0_35], %50 {strides = array<i32>} : memref<1x64x256xf32, #tpu.memory_space<vmem>>, vector<1x64x256xf32>,
    } else {
    }
    return
  }
  func.func @transform_0(%arg0: i32, %arg1: i32) -> (i32, i32, i32) {
    %c0_i32 = arith.constant 0 : i32
    %c0_i32_0 = arith.constant 0 : i32
    return %arg0, %c0_i32, %arg1 : i32, i32, i32
  }
  func.func @transform_1(%arg0: i32, %arg1: i32) -> (i32, i32) {
    %c0_i32 = arith.constant 0 : i32
    %c0_i32_0 = arith.constant 0 : i32
    %c0_i32_1 = arith.constant 0 : i32
    return %c0_i32, %c0_i32_0 : i32, i32
  }
  func.func @transform_2(%arg0: i32, %arg1: i32) -> (i32, i32) {
    %c0_i32 = arith.constant 0 : i32
    %c0_i32_0 = arith.constant 0 : i32
    %c0_i32_1 = arith.constant 0 : i32
    return %c0_i32, %c0_i32_0 : i32, i32
  }
  func.func @transform_3(%arg0: i32, %arg1: i32) -> (i32, i32, i32) {
    %c0_i32 = arith.constant 0 : i32
    %c0_i32_0 = arith.constant 0 : i32
    %c0_i32_1 = arith.constant 0 : i32
    return %arg0, %c0_i32, %c0_i32_0 : i32, i32, i32
  }
}

</mosaic_0001>

<bundles_post_ra>
// kernel: tpu_custom_call.1
= control target key start
LH: loop header
LB: loop body
LE: loop exit
PB: predicated region body
PF: predicated region fallthrough
CT: control target
= control target key end

     0   :  { %8 = vsyncpa [#allocation5], 0  ;;  %s1682_s0 = inlined_call_operand.hbm [shape: f32[2,64,256], index: 0, kind: input, shape index: {}]   ;;  %s1683_s1 = inlined_call_operand.vmem [shape: f32[4,64], index: 1, kind: input, shape index: {}]   ;;  %s1684_s2 = inlined_call_operand.vmem [shape: f32[64,4], index: 2, kind: input, shape index: {}]   ;;  %s1685_s3 = inlined_call_operand.hbm [shape: f32[2,64,256], index: 3, kind: output, shape index: {}]  }
   0x1   :  { %10 = vsyncpa [#allocation5 + $0x1], 0 }
   0x2   :  { %11 = vsyncpa [#allocation6], 0 }
   0x3   :  { %13 = vsyncpa [#allocation6 + $0x1], 0  ;;  %s1298_s12 = smov 0   ;;  %s1300_s13 = smov 0  }
   0x4   :  { %s1302_s14 = smov 0   ;;  %s1304_s15 = smov 0  }
   0x5   :  { %s1306_s16 = smov 0   ;;  %s1308_s17 = smov 0  }
   0x6 LB: > { %s921_s18 = sadd.s32 4294967295, %s1263_s17   ;;  %s922_s19 = sadd.s32 4294967294, %s1263_s17   ;;  %s1263_s17 = sphi %s1308_s17, %s19_s17   ;;  %s1259_s16 = sphi %s1306_s16, %s1700_s16   ;;  %s1255_s15 = sphi %s1304_s15, %s1699_s15   ;;  %s1251_s14 = sphi %s1302_s14, %s1698_s14   ;;  %s1247_s13 = sphi %s1300_s13, %s1697_s13   ;;  %s1243_s12 = sphi %s1298_s12, %s1696_s12  }
   0x7   : > { %s31_s20 = sadd.s32 1, %s1259_s16  ;;  %s40_s21 = sadd.s32 1, %s1251_s14 }
   0x8   : > { %p33_p0 = scmp.ge.s32.totalorder %s31_s20, 2  ;;  %p47_p1 = scmp.ne.s32.totalorder %s1251_s14, %s1247_s13 }
   0x9   : > { %p48_p2 = scmp.eq.s32.totalorder %s1263_s17, 0  ;;  %p53_p3 = scmp.ne.s32.totalorder %s1247_s13, %s1243_s12 }
   0xa   : > { %s1702_s20 = smov (%p33_p0, %s31_s20), 0  ;;  %p54_p5 = scmp.eq.s32.totalorder %s921_s18, 0 }
   0xb   : > { %p1339_p4 = por %p48_p2, %p47_p1  ;;  %s35_s23 = ssub.s32 %s1259_s16, %s1702_s20 }
   0xc   : > { %p119_p6 = scmp.eq.s32.totalorder %s921_s18, 1  ;;  %p38_p7 = scmp.eq.s32.totalorder %s35_s23, 0 }
   0xd   : > { %p1345_p8 = por %p54_p5, %p53_p3  ;;  %p125_p10 = scmp.eq.s32.totalorder %s922_s19, 1 }
   0xe   : > { %p1349_p9 = por %p119_p6, %p47_p1  ;;  %p1032_p13 = scmp.lt.s32.totalorder %s1263_s17, 2 }
   0xf   : > { %s1354_s26 = scalar_select %p38_p7, %s1251_s14, %s40_s21  }
  0x10   : > { %s1689_s25 = scalar_select %p1349_p9, 1, 0 }
  0x11   : > { %p1356_p11 = por %p125_p10, %p53_p3  ;;  %s151_s28 = sand.u32 1, %s1251_s14  }
  0x12   : > { %s925_s29 = sshll.u32 %s151_s28, 7  ;;  %s955_s30 = sshll.u32 %s1259_s16, 11 }
  0x13   : > { %s1690_s27 = scalar_select %p1356_p11, 1, 0 }
  0x14   : > { %s1367_s6 = scalar_lea.hbm %s1682_s0, %s955_s30  ;;  %s155_s7 = scalar_lea.vmem [#allocation4], %s925_s29 }
  0x15   : > { %s164_s8 = sshll.u32 %s155_s7, 4  ;;  %p1373_p0 = pnand %p1032_p13, %p1339_p4  ;;  %s1369_s8 = int_to_ptr.vmem [resolvable:$true] %s164_s8 }
  0x16   : > { %s1378_s10 = scalar_lea.sflag [#allocation5], %s151_s28  ;;  %s1151_s11 = scalar_lea.hbm %s1367_s6, 2048 }
  0x17   : > { %p1152_p2 = scmp.ne.s32.totalorder %s1367_s6, %s1151_s11  ;;  %p1153_p3 = pneg %p1373_p0 }
  0x18   : > { %s1156_s21 = scalar_lea.hbm %s1682_s0, 4096  ;;  %p1157_p4 = scmp.lt.u32.totalorder %s1367_s6, %s1682_s0 }
  0x19   : > { %p1154_p5 = pnand %p1153_p3, %p1152_p2  ;;  %p1158_p7 = scmp.lt.u32.totalorder %s1156_s21, %s1151_s11 }
  0x1a   : > { %p1160_p13 = scmp.lt.u32.totalorder %s1151_s11, %s1367_s6 }
  0x1b   : > { %p1155_p6 = pneg %p1154_p5  ;;  %p1159_p10 = por %p1158_p7, %p1157_p4 }
  0x1d   : > { %p1161_p12 = por %p1160_p13, %p1159_p10 }
  0x1f   : > { %p1162_p1 = pnand %p1161_p12, %p1155_p6 }
  0x21   : > { %1165 = shalt.err (!%p1162_p1)
}
  0x22   : > { %s1166_s28 = scalar_lea.vmem %s1369_s8, 2048  ;;  %s1265_s29 = smov [#allocation4]  }
  0x23   : > { %p1167_p2 = scmp.ne.s32.totalorder %s1369_s8, %s1166_s28  ;;  %s1171_s30 = sshll.u32 %s1265_s29, 4  ;;  %s1172_s30 = int_to_ptr.vmem [resolvable:$false] %s1171_s30 }
  0x24   : > { %s1173_s4 = scalar_lea.vmem %s1172_s30, 4096  ;;  %p1174_p9 = scmp.lt.s32.totalorder %s1369_s8, %s1172_s30 }
  0x25   : > { %p1169_p5 = pnand %p1167_p2, %p1153_p3  ;;  %p1175_p4 = scmp.lt.s32.totalorder %s1173_s4, %s1166_s28 }
  0x27   : > { %p1170_p11 = pneg %p1169_p5  ;;  %p1176_p7 = por %p1175_p4, %p1174_p9 }
  0x29   : > { %p1177_p10 = pnand %p1176_p7, %p1170_p11 }
  0x2b   : > { %1180 = shalt.err (!%p1177_p10)
}
  0x2c   : > { %s1266_s5 = smov 256   ;;  %s1267_s7 = smov 16  }
  0x2d   : > { %1027 = dma.hbm_to_vmem [thread:$0]  (!%p1373_p0), %s1367_s6, 2048, %s1369_s8, %s1378_s10, %s1266_s5, %s1266_s5, %s1267_s7  }
  0x2e   : > { %p172_p12 = scmp.lt.s32.totalorder %s1263_s17, 3  ;;  %p1692_p1 = scmp.ge.s32.totalorder %s1263_s17, 1 }
  0x30   : > { %p173_p3 = pnand %p1692_p1, %p172_p12 }
  0x31   : > { %s1410_s11 = sand.u32 (!%p173_p3), 1, %s1247_s13  }
  0x32   : > { %176 = sbr.rel (%p173_p3) target bundleno = 1112 (0x458), region = 32  ;;  %s929_s18 = sshll.u32 (!%p173_p3), %s1410_s11, 7 }
  0x33   : > { %s179_s19 = scalar_lea.sflag (!%p173_p3), [#allocation5], %s1410_s11  ;;  %s1416_s21 = scalar_lea.vmem (!%p173_p3), [#allocation4], %s929_s18 }
  0x39   : > { %1234 = dma.done.wait (%p1345_p8), %s179_s19, 2048  }
  0x3a   : > { %1236 = vsyncadd (%p1345_p8), %s179_s19, 4294965248  ;;  %vm210_vm0 = vcmask 7168   ;;  %v1268_v0 = vmov -inf   ;;  %v1431_v1 = vld [vmem:[%s1416_s21 + $0x20] sm:$0xff]  ;;  %v1434_v2 = vld [vmem:[%s1416_s21 + $0x28] sm:$0xff]  ;;  %v1269_v33 = vmov 0.0  }
  0x3b   : > { %221 = vst.msk [vmem:[#allocation3 + $0x10] sm:$0xff] %vm210_vm0, %v1268_v0  ;;  %219 = vst.msk [vmem:[#allocation3] sm:$0xff] %vm210_vm0, %v1268_v0  ;;  %v1437_v3 = vld [vmem:[%s1416_s21] sm:$0xff]  ;;  %v306_v4 = vmax.f32 %v1431_v1, %v1434_v2  ;;  %v1442_v5 = vld [vmem:[%s1416_s21 + $0x8] sm:$0xff]  ;;  %v257_v28 = vadd.f32 %v1434_v2, %v1431_v1  ;;  %v1270_v51 = vmov 0.0|0.0   ;;  %s1271_s24 = smov 1  }
  0x3c   : > { %220 = vst.msk [vmem:[#allocation3 + $0x8] sm:$0xff] %vm210_vm0, %v1268_v0  ;;  %222 = vst.msk [vmem:[#allocation3 + $0x18] sm:$0xff] %vm210_vm0, %v1268_v0  ;;  %v1445_v6 = vld [vmem:[%s1416_s21 + $0x30] sm:$0xff]  ;;  %v1448_v7 = vld [vmem:[%s1416_s21 + $0x38] sm:$0xff]  ;;  %v300_v8 = vmax.f32 %v1437_v3, %v1442_v5  ;;  %v251_v26 = vadd.f32 %v1442_v5, %v1437_v3  ;;  %1008 = vmatprep.subr.bf16.mxu0 %v1270_v51  ;;  %vm1272_vm1 = vmmov 0   ;;  %vm424_vm2 = vcmask 523264  }
  0x3d   : > { %223 = vst.msk [vmem:[#allocation3 + $0x20] sm:$0xff] %vm210_vm0, %v1268_v0  ;;  %224 = vst.msk [vmem:[#allocation3 + $0x28] sm:$0xff] %vm210_vm0, %v1268_v0  ;;  %v1453_v9 = vld [vmem:[%s1416_s21 + $0x10] sm:$0xff]  ;;  %v1456_v10 = vld [vmem:[%s1416_s21 + $0x18] sm:$0xff]  ;;  %307 = vmax.xlane.f32.xlu1 %v306_v4  ;;  %v309_v11 = vmax.f32 %v1445_v6, %v1448_v7  ;;  %v260_v27 = vadd.f32 %v1448_v7, %v1445_v6  ;;  %991 = vmatprep.mubr.msk.f32.mxu0 %vm1272_vm1, %v1269_v33  ;;  %vm513_vm3 = vcmask 31744   ;;  %vm538_vm4 = vcmask 1043456  }
  0x3e   : > { %225 = vst.msk [vmem:[#allocation3 + $0x30] sm:$0xff] %vm210_vm0, %v1268_v0  ;;  %226 = vst.msk [vmem:[#allocation3 + $0x38] sm:$0xff] %vm210_vm0, %v1268_v0  ;;  %301 = vmax.xlane.f32.xlu0 %v300_v8  ;;  %v303_v12 = vmax.f32 %v1453_v9, %v1456_v10  ;;  %v1463_v13 = vld [vmem:[%s1416_s21 + $0x50] sm:$0xff]  ;;  %v1466_v14 = vld [vmem:[%s1416_s21 + $0x58] sm:$0xff]  ;;  %v254_v25 = vadd.f32 %v1456_v10, %v1453_v9  ;;  %s1273_s10 = smov 127   ;;  %s1596_s22 = scalar_lea.vmem [#allocation7], %s929_s18 }
  0x3f   : > { %v1469_v15 = vld [vmem:[%s1416_s21 + $0x40] sm:$0xff]  ;;  %v1472_v16 = vld [vmem:[%s1416_s21 + $0x48] sm:$0xff]  ;;  %v315_v17 = vmax.f32 %v1463_v13, %v1466_v14  ;;  %v1479_v19 = vld [vmem:[%s1416_s21 + $0x70] sm:$0xff]  ;;  %v266_v29 = vadd.f32 %v1466_v14, %v1463_v13  ;;  %212 = vst.msk [vmem:[#allocation2 + $0x8] sm:$0xff] %vm210_vm0, %v1269_v33  ;;  %s956_s18 = sshll.u32 %s1255_s15, 11  ;;  %s837_s23 = sshll.u32 %s1596_s22, 4  ;;  %s1627_s23 = int_to_ptr.vmem [resolvable:$true] %s837_s23 }
  0x40   : > { %v312_v18 = vmax.f32 %v1469_v15, %v1472_v16  ;;  %v1482_v20 = vld [vmem:[%s1416_s21 + $0x78] sm:$0xff]  ;;  %v1485_v21 = vld [vmem:[%s1416_s21 + $0x60] sm:$0xff]  ;;  %v1488_v22 = vld [vmem:[%s1416_s21 + $0x68] sm:$0xff]  ;;  %v263_v30 = vadd.f32 %v1472_v16, %v1469_v15  ;;  %211 = vst.msk [vmem:[#allocation2] sm:$0xff] %vm210_vm0, %v1269_v33  ;;  %s1625_s30 = scalar_lea.hbm %s1685_s3, %s956_s18  ;;  %s824_s15 = scalar_lea.sflag [#allocation6], %s1410_s11 }
  0x41   : > { %310 = vmax.xlane.f32.xlu1 %v309_v11  ;;  %v321_v23 = vmax.f32 %v1479_v19, %v1482_v20  ;;  %v318_v24 = vmax.f32 %v1485_v21, %v1488_v22  ;;  %v272_v31 = vadd.f32 %v1482_v20, %v1479_v19  ;;  %v269_v32 = vadd.f32 %v1488_v22, %v1485_v21  ;;  %s1181_s4 = scalar_lea.vmem %s1627_s23, 2048  ;;  %p1693_p9 = scmp.ne.s32.totalorder %s1689_s25, 0 }
  0x42   : > { %304 = vmax.xlane.f32.xlu0 %v303_v12  ;;  %213 = vst.msk [vmem:[#allocation2 + $0x10] sm:$0xff] %vm210_vm0, %v1269_v33  ;;  %214 = vst.msk [vmem:[#allocation2 + $0x18] sm:$0xff] %vm210_vm0, %v1269_v33  ;;  %v294_v34 = vld [vmem:[#allocation3 + $0x10] sm:$0xff]  ;;  %v292_v35 = vld [vmem:[#allocation3] sm:$0xff]  ;;  %p1182_p8 = scmp.ne.s32.totalorder %s1627_s23, %s1181_s4  ;;  %s1275_s5 = smov [#allocation7]  }
  0x43   : > { %215 = vst.msk [vmem:[#allocation2 + $0x20] sm:$0xff] %vm210_vm0, %v1269_v33  ;;  %216 = vst.msk [vmem:[#allocation2 + $0x28] sm:$0xff] %vm210_vm0, %v1269_v33  ;;  %v295_v40 = vld [vmem:[#allocation3 + $0x18] sm:$0xff]  ;;  %v293_v41 = vld [vmem:[#allocation3 + $0x8] sm:$0xff]  ;;  %s1185_s7 = sshll.u32 %s1275_s5, 4  ;;  %s1186_s7 = int_to_ptr.vmem [resolvable:$false] %s1185_s7 }
  0x44   : > { %217 = vst.msk [vmem:[#allocation2 + $0x30] sm:$0xff] %vm210_vm0, %v1269_v33  ;;  %218 = vst.msk [vmem:[#allocation2 + $0x38] sm:$0xff] %vm210_vm0, %v1269_v33  ;;  %v297_v46 = vld [vmem:[#allocation3 + $0x28] sm:$0xff]  ;;  %v296_v47 = vld [vmem:[#allocation3 + $0x20] sm:$0xff]  ;;  %p1183_p11 = pnand %p1182_p8, %p1693_p9  ;;  %s1187_s19 = scalar_lea.vmem %s1186_s7, 4096 }
  0x45   : > { %316 = vmax.xlane.f32.xlu1 %v315_v17  ;;  %v299_v53 = vld [vmem:[#allocation3 + $0x38] sm:$0xff]  ;;  %v298_v54 = vld [vmem:[#allocation3 + $0x30] sm:$0xff]  ;;  %p1188_p6 = scmp.lt.s32.totalorder %s1627_s23, %s1186_s7  ;;  %p1189_p13 = scmp.lt.s32.totalorder %s1187_s19, %s1181_s4 }
  0x46   : > { %313 = vmax.xlane.f32.xlu0 %v312_v18  ;;  %v244_v61 = vld [vmem:[#allocation2 + $0x8] sm:$0xff]  ;;  %p1184_p0 = pneg %p1183_p11 }
  0x47   : > { %v243_v4 = vld [vmem:[#allocation2] sm:$0xff]  ;;  %p1190_p2 = por %p1189_p13, %p1188_p6 }
  0x49   : > { %322 = vmax.xlane.f32.xlu1 %v321_v23  ;;  %p1191_p5 = pnand %p1190_p2, %p1184_p0 }
  0x4a   : > { %319 = vmax.xlane.f32.xlu0 %v318_v24  ;;  %v246_v24 = vld [vmem:[#allocation2 + $0x18] sm:$0xff] }
  0x4d   : > { %255 = vadd.xlane.f32.xlu1 %v254_v25 }
  0x4e   : > { %252 = vadd.xlane.f32.xlu0 %v251_v26  ;;  %v245_v26 = vld [vmem:[#allocation2 + $0x10] sm:$0xff] }
  0x51   : > { %261 = vadd.xlane.f32.xlu1 %v260_v27 }
  0x52   : > { %258 = vadd.xlane.f32.xlu0 %v257_v28 }
  0x55   : > { %267 = vadd.xlane.f32.xlu1 %v266_v29 }
  0x56   : > { %264 = vadd.xlane.f32.xlu0 %v263_v30 }
  0x59   : > { %273 = vadd.xlane.f32.xlu1 %v272_v31 }
  0x5a   : > { %270 = vadd.xlane.f32.xlu0 %v269_v32 }
  0xca   : > { %v308_v36 = vpop.xlane.xlu1 %307 }
  0xcb   : > { %v326_v37 = vmax.f32 %v294_v34, %v308_v36  ;;  %v302_v38 = vpop.xlane.xlu0 %301  ;;  %v248_v34 = vld [vmem:[#allocation2 + $0x28] sm:$0xff]  ;;  %v247_v36 = vld [vmem:[#allocation2 + $0x20] sm:$0xff] }
  0xcc   : > { %v324_v39 = vmax.f32 %v292_v35, %v302_v38 }
  0xcd   : > { %334 = vst.msk [vmem:[#allocation3 + $0x10] sm:$0xff] %vm210_vm0, %v326_v37 }
  0xce   : > { %332 = vst.msk [vmem:[#allocation3] sm:$0xff] %vm210_vm0, %v324_v39  ;;  %v311_v42 = vpop.xlane.xlu1 %310 }
  0xcf   : > { %v327_v43 = vmax.f32 %v295_v40, %v311_v42  ;;  %v305_v44 = vpop.xlane.xlu0 %304  ;;  %v250_v42 = vld [vmem:[#allocation2 + $0x38] sm:$0xff] }
  0xd0   : > { %v325_v45 = vmax.f32 %v293_v41, %v305_v44 }
  0xd1   : > { %335 = vst.msk [vmem:[#allocation3 + $0x18] sm:$0xff] %vm210_vm0, %v327_v43  ;;  %v249_v43 = vld [vmem:[#allocation2 + $0x30] sm:$0xff] }
  0xd2   : > { %333 = vst.msk [vmem:[#allocation3 + $0x8] sm:$0xff] %vm210_vm0, %v325_v45  ;;  %v317_v48 = vpop.xlane.xlu1 %316 }
  0xd3   : > { %v329_v49 = vmax.f32 %v297_v46, %v317_v48  ;;  %v314_v50 = vpop.xlane.xlu0 %313 }
  0xd4   : > { %v328_v52 = vmax.f32 %v296_v47, %v314_v50  ;;  %v377_v56 = vld [vmem:[#allocation3 + $0x10] sm:$0xff] }
  0xd5   : > { %337 = vst.msk [vmem:[#allocation3 + $0x28] sm:$0xff] %vm210_vm0, %v329_v49  ;;  %v375_v63 = vld [vmem:[#allocation3] sm:$0xff] }
  0xd6   : > { %336 = vst.msk [vmem:[#allocation3 + $0x20] sm:$0xff] %vm210_vm0, %v328_v52  ;;  %v323_v55 = vpop.xlane.xlu1 %322 }
  0xd7   : > { %v331_v57 = vmax.f32 %v299_v53, %v323_v55  ;;  %v320_v58 = vpop.xlane.xlu0 %319 }
  0xd8   : > { %v330_v59 = vmax.f32 %v298_v54, %v320_v58  ;;  %v378_v60 = vld [vmem:[#allocation3 + $0x18] sm:$0xff] }
  0xd9   : > { %339 = vst.msk [vmem:[#allocation3 + $0x38] sm:$0xff] %vm210_vm0, %v331_v57  ;;  %v1098_v62 = vpack.i.bf16 %v378_v60, %v377_v56  ;;  %v376_v0 = vld [vmem:[#allocation3 + $0x8] sm:$0xff] }
  0xda   : > { %338 = vst.msk [vmem:[#allocation3 + $0x30] sm:$0xff] %vm210_vm0, %v330_v59  ;;  %v1093_v8 = vpack.i.bf16 %v376_v0, %v375_v63  ;;  %v256_v11 = vpop.xlane.xlu1 %255 }
  0xdb   : > { %1099 = vrot.lane.b32.xlu1 %v1098_v62, %s1271_s24  ;;  %v276_v12 = vadd.f32 %v256_v11, %v244_v61  ;;  %v253_v17 = vpop.xlane.xlu0 %252 }
  0xdc   : > { %1094 = vrot.lane.b32.xlu0 %v1093_v8, %s1271_s24  ;;  %v380_v18 = vld [vmem:[#allocation3 + $0x28] sm:$0xff]  ;;  %v275_v23 = vadd.f32 %v253_v17, %v243_v4 }
  0xdd   : > { %v379_v25 = vld [vmem:[#allocation3 + $0x20] sm:$0xff]  ;;  %285 = vst.msk [vmem:[#allocation2 + $0x8] sm:$0xff] %vm210_vm0, %v276_v12 }
  0xde   : > { %v1103_v27 = vpack.i.bf16 %v380_v18, %v379_v25  ;;  %284 = vst.msk [vmem:[#allocation2] sm:$0xff] %vm210_vm0, %v275_v23  ;;  %v262_v28 = vpop.xlane.xlu1 %261 }
  0xdf   : > { %v278_v29 = vadd.f32 %v262_v28, %v246_v24  ;;  %v259_v30 = vpop.xlane.xlu0 %258 }
  0xe0   : > { %1104 = vrot.lane.b32.xlu1 %v1103_v27, %s1271_s24  ;;  %v382_v31 = vld [vmem:[#allocation3 + $0x38] sm:$0xff]  ;;  %v277_v32 = vadd.f32 %v259_v30, %v245_v26 }
  0xe1   : > { %v381_v35 = vld [vmem:[#allocation3 + $0x30] sm:$0xff]  ;;  %287 = vst.msk [vmem:[#allocation2 + $0x18] sm:$0xff] %vm210_vm0, %v278_v29 }
  0xe2   : > { %v1108_v37 = vpack.i.bf16 %v382_v31, %v381_v35  ;;  %286 = vst.msk [vmem:[#allocation2 + $0x10] sm:$0xff] %vm210_vm0, %v277_v32  ;;  %v268_v38 = vpop.xlane.xlu1 %267 }
  0xe3   : > { %v280_v39 = vadd.f32 %v268_v38, %v248_v34  ;;  %v265_v40 = vpop.xlane.xlu0 %264 }
  0xe4   : > { %1109 = vrot.lane.b32.xlu1 %v1108_v37, %s1271_s24  ;;  %v279_v41 = vadd.f32 %v265_v40, %v247_v36  ;;  %v360_v48 = vld [vmem:[#allocation2 + $0x8] sm:$0xff] }
  0xe5   : > { %289 = vst.msk [vmem:[#allocation2 + $0x28] sm:$0xff] %vm210_vm0, %v280_v39  ;;  %v359_v33 = vld [vmem:[#allocation2] sm:$0xff]  ;;  %v368_v54 = vmul.f32 0.00390625, %v360_v48  ;;  %v506_v48 = vld [vmem:[%s1684_s2 + $0x8] sm:$0xff] }
  0xe6   : > { %288 = vst.msk [vmem:[#allocation2 + $0x20] sm:$0xff] %vm210_vm0, %v279_v41  ;;  %v274_v44 = vpop.xlane.xlu1 %273  ;;  %v367_v53 = vmul.f32 0.00390625, %v359_v33  ;;  %v423_v41 = vld [vmem:[%s1683_s1] sm:$0xf] }
  0xe7   : > { %v282_v45 = vadd.f32 %v274_v44, %v250_v42  ;;  %v271_v46 = vpop.xlane.xlu0 %270  ;;  %v505_v42 = vld [vmem:[%s1684_s2] sm:$0xff] }
  0xe8   : > { %v281_v47 = vadd.f32 %v271_v46, %v249_v43  ;;  %v362_v49 = vld [vmem:[#allocation2 + $0x18] sm:$0xff]  ;;  %996 = vmatprep.mubr.msk.f32.mxu1 %vm513_vm3, %v505_v42 }
  0xe9   : > { %291 = vst.msk [vmem:[#allocation2 + $0x38] sm:$0xff] %vm210_vm0, %v282_v45  ;;  %v361_v55 = vld [vmem:[#allocation2 + $0x10] sm:$0xff]  ;;  %v370_v56 = vmul.f32 0.00390625, %v362_v49 }
  0xea   : > { %290 = vst.msk [vmem:[#allocation2 + $0x30] sm:$0xff] %vm210_vm0, %v281_v47  ;;  %v369_v0 = vmul.f32 0.00390625, %v361_v55  ;;  %v507_v49 = vld [vmem:[%s1684_s2 + $0x10] sm:$0xff]  ;;  %v512_v55 = vld [vmem:[%s1684_s2 + $0x38] sm:$0xff] }
  0xec   : > { %v364_v61 = vld [vmem:[#allocation2 + $0x28] sm:$0xff] }
  0xed   : > { %v363_v11 = vld [vmem:[#allocation2 + $0x20] sm:$0xff]  ;;  %v372_v12 = vmul.f32 0.00390625, %v364_v61 }
  0xee   : > { %v371_v26 = vmul.f32 0.00390625, %v363_v11 }
  0xf0   : > { %v366_v25 = vld [vmem:[#allocation2 + $0x38] sm:$0xff] }
  0xf1   : > { %v365_v29 = vld [vmem:[#allocation2 + $0x30] sm:$0xff]  ;;  %v374_v30 = vmul.f32 0.00390625, %v366_v25 }
  0xf2   : > { %v373_v36 = vmul.f32 0.00390625, %v365_v29 }
 0x14d   : > { %v1100_v50 = vpop.permute.xlu1 %1099 }
 0x14e   : > { %v1095_v52 = vpop.permute.xlu0 %1094  ;;  %v1102_v57 = vunpack.i.h.bf16 %v1100_v50  ;;  %v1101_v58 = vunpack.i.l.bf16 %v1100_v50  ;;  %v508_v50 = vld [vmem:[%s1684_s2 + $0x18] sm:$0xff] }
 0x14f   : > { %v1097_v59 = vunpack.i.h.bf16 %v1095_v52  ;;  %v1096_v60 = vunpack.i.l.bf16 %v1095_v52  ;;  %v509_v52 = vld [vmem:[%s1684_s2 + $0x20] sm:$0xff] }
 0x150   : > { %v417_v23 = vsel %vm210_vm0, %v369_v0, %v1101_v58  ;;  %v418_v24 = vsel %vm210_vm0, %v370_v56, %v1102_v57  ;;  %v1274_v0 = vmov 0  }
 0x151   : > { %v415_v62 = vsel %vm210_vm0, %v367_v53, %v1096_v60  ;;  %v416_v63 = vsel %vm210_vm0, %v368_v54, %v1097_v59  ;;  %v1012_v28 = vpack.c.bf16 %v418_v24, %v417_v23  ;;  %v510_v53 = vld [vmem:[%s1684_s2 + $0x28] sm:$0xff]  ;;  %v511_v54 = vld [vmem:[%s1684_s2 + $0x30] sm:$0xff]  ;;  %1113 = vset.pattern.permute.xlu1 %v1274_v0  ;;  %1114 = vset.pattern.permute.xlu0 %v1274_v0 }
 0x152   : > { %v1105_v4 = vpop.permute.xlu1 %1104  ;;  %v1009_v8 = vpack.c.bf16 %v416_v63, %v415_v62 }
 0x153   : > { %v1107_v17 = vunpack.i.h.bf16 %v1105_v4  ;;  %v1106_v18 = vunpack.i.l.bf16 %v1105_v4 }
 0x154   : > { %1010 = vmatpush3.bf16.msra.mxu0 %v1009_v8 }
 0x155   : > { %1011 = vmatprep.subr.bf16.mxu0 %v1270_v51  ;;  %v419_v34 = vsel %vm210_vm0, %v371_v26, %v1106_v18  ;;  %v420_v35 = vsel %vm210_vm0, %v372_v12, %v1107_v17 }
 0x156   : > { %v1110_v27 = vpop.permute.xlu1 %1109  ;;  %v1015_v37 = vpack.c.bf16 %v420_v35, %v419_v34 }
 0x157   : > { %v1112_v31 = vunpack.i.h.bf16 %v1110_v27  ;;  %v1111_v32 = vunpack.i.l.bf16 %v1110_v27 }
 0x158   : > { %1013 = vmatpush3.bf16.msra.mxu0 %v1012_v28 }
 0x159   : > { %1014 = vmatprep.subr.bf16.mxu0 %v1270_v51  ;;  %v421_v38 = vsel %vm210_vm0, %v373_v36, %v1111_v32  ;;  %v422_v39 = vsel %vm210_vm0, %v374_v30, %v1112_v31 }
 0x15a   : > { %v1018_v40 = vpack.c.bf16 %v422_v39, %v421_v38 }
 0x15c   : > { %1016 = vmatpush3.bf16.msra.mxu0 %v1015_v37 }
 0x15d   : > { %1017 = vmatprep.subr.bf16.mxu0 %v1270_v51 }
 0x160   : > { %1019 = vmatpush3.bf16.msra.mxu0 %v1018_v40 }
 0x163   : > { %992 = vmatmul.mubr.msk.f32.vlgmr.msra.gmra.mrb[0].mxu0 %vm424_vm2, %v423_v41 }
 0x236   : > { %v494_v43 = vpop.f32.mrb[0].mxu0 }
 0x237   : > { %v932_v44 = vmul.f32 -1.442695, %v494_v43  ;;  %v993_v45 = vpop.f32.mrb[1].mxu0 }
 0x239   : > { %1115 = vpow2.f32 %v932_v44 }
 0x243   : > { %v1116_v51 = vpop.eup %1115 }
 0x244   : > { %v501_v46 = vadd.f32 1.0, %v1116_v51 }
 0x246   : > { %1117 = vrcp.f32 %v501_v46 }
 0x250   : > { %v1118_v47 = vpop.eup %1117 }
 0x251   : > { %v504_v33 = vmul.f32 %v1118_v47, %v494_v43 }
 0x253   : > { %994 = vmatprep.subr.msk.mxu1 %vm538_vm4, %v504_v33 }
 0x254   : > { %995 = vmatpush3.msk.msra.mxu1 %vm538_vm4, %v504_v33 }
 0x255   : > { %997 = vmatmul.mubr.msk.f32.vlgmr.msra.gmra.mrb[0].mxu1 %vm513_vm3, %v506_v48 }
 0x256   : > { %999 = vmatprep.mubr.msk.f32.mxu1 %vm513_vm3, %v507_v49 }
 0x259   : > { %1000 = vmatmul.mubr.msk.f32.gmra.mrb[2].mxu1 %vm513_vm3, %v508_v50 }
 0x25a   : > { %1002 = vmatprep.mubr.msk.f32.mxu1 %vm513_vm3, %v509_v52 }
 0x25d   : > { %1003 = vmatmul.mubr.msk.f32.gmra.mrb[4].mxu1 %vm513_vm3, %v510_v53 }
 0x25e   : > { %1005 = vmatprep.mubr.msk.f32.mxu1 %vm513_vm3, %v511_v54 }
 0x261   : > { %1006 = vmatmul.mubr.msk.f32.gmra.mrb[6].mxu1 %vm513_vm3, %v512_v55 }
 0x328   : > { %v998_v56 = vpop.f32.mrb[0].mxu1 }
 0x329   : > { %657 = vrot.lane.b32.xlu1 %v998_v56, %s1273_s10  ;;  %v608_v57 = vpop.f32.mrb[1].mxu1 }
 0x32a   : > { %655 = vrot.lane.b32.xlu0 %v608_v57, %s1273_s10 }
 0x32c   : > { %v1001_v58 = vpop.f32.mrb[2].mxu1 }
 0x32d   : > { %661 = vrot.lane.b32.xlu1 %v1001_v58, %s1273_s10  ;;  %v618_v59 = vpop.f32.mrb[3].mxu1 }
 0x32e   : > { %659 = vrot.lane.b32.xlu0 %v618_v59, %s1273_s10 }
 0x330   : > { %v1004_v60 = vpop.f32.mrb[4].mxu1 }
 0x331   : > { %665 = vrot.lane.b32.xlu1 %v1004_v60, %s1273_s10  ;;  %v628_v61 = vpop.f32.mrb[5].mxu1 }
 0x332   : > { %663 = vrot.lane.b32.xlu0 %v628_v61, %s1273_s10 }
 0x334   : > { %v1007_v62 = vpop.f32.mrb[6].mxu1 }
 0x335   : > { %669 = vrot.lane.b32.xlu1 %v1007_v62, %s1273_s10  ;;  %v638_v63 = vpop.f32.mrb[7].mxu1 }
 0x336   : > { %667 = vrot.lane.b32.xlu0 %v638_v63, %s1273_s10 }
 0x39b   : > { %v658_v4 = vpop.permute.xlu1 %657 }
 0x39c   : > { %v680_v8 = vadd.f32 %v998_v56, %v658_v4  ;;  %v656_v11 = vpop.permute.xlu0 %655 }
 0x39d   : > { %v679_v12 = vadd.f32 %v656_v11, %v608_v57 }
 0x39e   : > { %v943_v17 = vmul.f32 -1.442695, %v680_v8 }
 0x39f   : > { %v942_v18 = vmul.f32 -1.442695, %v679_v12  ;;  %v662_v23 = vpop.permute.xlu1 %661 }
 0x3a0   : > { %1119 = vpow2.f32 %v943_v17  ;;  %v682_v24 = vadd.f32 %v1001_v58, %v662_v23  ;;  %v660_v25 = vpop.permute.xlu0 %659 }
 0x3a1   : > { %1121 = vpow2.f32 %v942_v18  ;;  %v681_v26 = vadd.f32 %v660_v25, %v618_v59 }
 0x3a2   : > { %v945_v27 = vmul.f32 -1.442695, %v682_v24 }
 0x3a3   : > { %v944_v28 = vmul.f32 -1.442695, %v681_v26  ;;  %v666_v29 = vpop.permute.xlu1 %665 }
 0x3a4   : > { %1123 = vpow2.f32 %v945_v27  ;;  %v684_v30 = vadd.f32 %v1004_v60, %v666_v29  ;;  %v664_v31 = vpop.permute.xlu0 %663 }
 0x3a5   : > { %1125 = vpow2.f32 %v944_v28  ;;  %v683_v32 = vadd.f32 %v664_v31, %v628_v61 }
 0x3a6   : > { %v947_v34 = vmul.f32 -1.442695, %v684_v30 }
 0x3a7   : > { %v946_v35 = vmul.f32 -1.442695, %v683_v32  ;;  %v670_v36 = vpop.permute.xlu1 %669 }
 0x3a8   : > { %1127 = vpow2.f32 %v947_v34  ;;  %v686_v37 = vadd.f32 %v1007_v62, %v670_v36  ;;  %v668_v38 = vpop.permute.xlu0 %667 }
 0x3a9   : > { %1129 = vpow2.f32 %v946_v35  ;;  %v685_v39 = vadd.f32 %v668_v38, %v638_v63 }
 0x3aa   : > { %v1120_v40 = vpop.eup %1119  ;;  %v949_v41 = vmul.f32 -1.442695, %v686_v37 }
 0x3ab   : > { %v1122_v42 = vpop.eup %1121  ;;  %v712_v43 = vadd.f32 1.0, %v1120_v40  ;;  %v948_v44 = vmul.f32 -1.442695, %v685_v39 }
 0x3ac   : > { %v711_v45 = vadd.f32 1.0, %v1122_v42  ;;  %1131 = vpow2.f32 %v949_v41 }
 0x3ad   : > { %1133 = vrcp.f32 %v712_v43 }
 0x3ae   : > { %v1124_v51 = vpop.eup %1123  ;;  %1135 = vrcp.f32 %v711_v45 }
 0x3af   : > { %v1126_v46 = vpop.eup %1125  ;;  %v714_v47 = vadd.f32 1.0, %v1124_v51  ;;  %1137 = vpow2.f32 %v948_v44 }
 0x3b0   : > { %v713_v33 = vadd.f32 1.0, %v1126_v46 }
 0x3b1   : > { %1139 = vrcp.f32 %v714_v47 }
 0x3b2   : > { %v1128_v48 = vpop.eup %1127  ;;  %1141 = vrcp.f32 %v713_v33 }
 0x3b3   : > { %v1130_v49 = vpop.eup %1129  ;;  %v716_v50 = vadd.f32 1.0, %v1128_v48 }
 0x3b4   : > { %v715_v52 = vadd.f32 1.0, %v1130_v49 }
 0x3b5   : > { %1143 = vrcp.f32 %v716_v50 }
 0x3b6   : > { %v1132_v53 = vpop.eup %1131  ;;  %1145 = vrcp.f32 %v715_v52 }
 0x3b7   : > { %v1134_v54 = vpop.eup %1133  ;;  %v718_v55 = vadd.f32 1.0, %v1132_v53 }
 0x3b8   : > { %v1136_v56 = vpop.eup %1135  ;;  %758 = vperm.xlu1 %1113, %v1134_v54  }
 0x3b9   : > { %v1138_v57 = vpop.eup %1137  ;;  %1147 = vrcp.f32 %v718_v55  ;;  %753 = vperm.xlu0 %1114, %v1136_v56  }
 0x3ba   : > { %v717_v58 = vadd.f32 1.0, %v1138_v57 }
 0x3bb   : > { %v1140_v59 = vpop.eup %1139 }
 0x3bc   : > { %v1142_v60 = vpop.eup %1141  ;;  %1149 = vrcp.f32 %v717_v58 }
 0x3bd   : > { %763 = vperm.xlu1 %1113, %v1142_v60   ;;  %768 = vperm.xlu0 %1114, %v1140_v59  }
 0x3bf   : > { %v1144_v61 = vpop.eup %1143 }
 0x3c0   : > { %v1146_v62 = vpop.eup %1145 }
 0x3c1   : > { %773 = vperm.xlu1 %1113, %v1146_v62   ;;  %778 = vperm.xlu0 %1114, %v1144_v61  }
 0x3c3   : > { %v1148_v63 = vpop.eup %1147 }
 0x3c5   : > { %788 = vperm.xlu0 %1114, %v1148_v63  }
 0x3c6   : > { %v1150_v0 = vpop.eup %1149 }
 0x3c7   : > { %783 = vperm.xlu1 %1113, %v1150_v0  }
 0x437   : > { %v759_v4 = vpop.permute.xlu1 %758 }
 0x438   : > { %v793_v8 = vmul.f32 %v759_v4, %v1453_v9  ;;  %v794_v11 = vmul.f32 %v759_v4, %v1456_v10  ;;  %v754_v12 = vpop.permute.xlu0 %753 }
 0x439   : > { %v791_v17 = vmul.f32 %v754_v12, %v1437_v3  ;;  %v792_v18 = vmul.f32 %v754_v12, %v1442_v5 }
 0x43a   : > { %809 = vst [vmem:[%s1596_s22 + $0x10] sm:$0xff] %v793_v8  ;;  %810 = vst [vmem:[%s1596_s22 + $0x18] sm:$0xff] %v794_v11 }
 0x43b   : > { %807 = vst [vmem:[%s1596_s22] sm:$0xff] %v791_v17  ;;  %808 = vst [vmem:[%s1596_s22 + $0x8] sm:$0xff] %v792_v18 }
 0x43c   : > { %v764_v9 = vpop.permute.xlu1 %763  ;;  %v769_v3 = vpop.permute.xlu0 %768 }
 0x43d   : > { %v795_v5 = vmul.f32 %v764_v9, %v1431_v1  ;;  %v796_v10 = vmul.f32 %v764_v9, %v1434_v2  ;;  %v797_v23 = vmul.f32 %v769_v3, %v1445_v6  ;;  %v798_v24 = vmul.f32 %v769_v3, %v1448_v7 }
 0x43f   : > { %811 = vst [vmem:[%s1596_s22 + $0x20] sm:$0xff] %v795_v5  ;;  %812 = vst [vmem:[%s1596_s22 + $0x28] sm:$0xff] %v796_v10 }
 0x440   : > { %813 = vst [vmem:[%s1596_s22 + $0x30] sm:$0xff] %v797_v23  ;;  %814 = vst [vmem:[%s1596_s22 + $0x38] sm:$0xff] %v798_v24  ;;  %v774_v25 = vpop.permute.xlu1 %773  ;;  %v779_v26 = vpop.permute.xlu0 %778 }
 0x441   : > { %v799_v27 = vmul.f32 %v774_v25, %v1469_v15  ;;  %v800_v1 = vmul.f32 %v774_v25, %v1472_v16  ;;  %v801_v28 = vmul.f32 %v779_v26, %v1463_v13  ;;  %v802_v2 = vmul.f32 %v779_v26, %v1466_v14 }
 0x443   : > { %815 = vst [vmem:[%s1596_s22 + $0x40] sm:$0xff] %v799_v27  ;;  %816 = vst [vmem:[%s1596_s22 + $0x48] sm:$0xff] %v800_v1 }
 0x444   : > { %817 = vst [vmem:[%s1596_s22 + $0x50] sm:$0xff] %v801_v28  ;;  %818 = vst [vmem:[%s1596_s22 + $0x58] sm:$0xff] %v802_v2  ;;  %v789_v6 = vpop.permute.xlu0 %788 }
 0x445   : > { %v805_v7 = vmul.f32 %v789_v6, %v1479_v19  ;;  %v806_v15 = vmul.f32 %v789_v6, %v1482_v20 }
 0x446   : > { %v784_v13 = vpop.permute.xlu1 %783 }
 0x447   : > { %v803_v14 = vmul.f32 %v784_v13, %v1485_v21  ;;  %v804_v16 = vmul.f32 %v784_v13, %v1488_v22  ;;  %821 = vst [vmem:[%s1596_s22 + $0x70] sm:$0xff] %v805_v7  ;;  %822 = vst [vmem:[%s1596_s22 + $0x78] sm:$0xff] %v806_v15 }
 0x449   : > { %819 = vst [vmem:[%s1596_s22 + $0x60] sm:$0xff] %v803_v14  ;;  %820 = vst [vmem:[%s1596_s22 + $0x68] sm:$0xff] %v804_v16 }
 0x44a   : > { %1194 = shalt.err (!%p1191_p5)
}
 0x44b   : > { %s1195_s21 = scalar_lea.hbm %s1625_s30, 2048  ;;  %s1199_s8 = scalar_lea.hbm %s1685_s3, 4096 }
 0x44c   : > { %p1196_p4 = scmp.ne.s32.totalorder %s1625_s30, %s1195_s21  ;;  %p1200_p12 = scmp.lt.u32.totalorder %s1625_s30, %s1685_s3 }
 0x44d   : > { %p1201_p1 = scmp.lt.u32.totalorder %s1199_s8, %s1195_s21  ;;  %p1203_p8 = scmp.lt.u32.totalorder %s1195_s21, %s1625_s30 }
 0x44e   : > { %p1197_p7 = pnand %p1196_p4, %p1693_p9 }
 0x44f   : > { %p1202_p3 = por %p1201_p1, %p1200_p12 }
 0x450   : > { %p1198_p10 = pneg %p1197_p7 }
 0x451   : > { %p1204_p11 = por %p1203_p8, %p1202_p3 }
 0x453   : > { %p1205_p0 = pnand %p1204_p11, %p1198_p10 }
 0x455   : > { %1208 = shalt.err (!%p1205_p0)
}
 0x456   : > { %s1276_s22 = smov 256   ;;  %s1277_s18 = smov 16  }
 0x457   : > { %1022 = dma.vmem_to_hbm [thread:$0]  (%p1693_p9), %s1627_s23, 2048, %s1625_s30, %s824_s15, %s1276_s22, %s1276_s22, %s1277_s18  }
 0x458 PF: > { %s852_s28 = sand.u32 1, %s1243_s12   ;;  %p1694_p6 = scmp.ne.s32.totalorder %s1690_s27, 0 }
 0x459   : > { %p1695_p13 = scmp.ge.s32.totalorder %s1263_s17, 2  ;;  %s853_s29 = scalar_lea.sflag [#allocation6], %s852_s28 }
 0x45b   : > { %p1029_p2 = pnand %p1695_p13, %p1694_p6 }
 0x45d   : > { %1238 = dma.done.wait (!%p1029_p2), %s853_s29, 2048  }
 0x45e   : > { %1240 = vsyncadd (!%p1029_p2), %s853_s29, 4294965248  ;;  %s19_s17 = sadd.s32 1, %s1263_s17   ;;  %s1696_s12 = smov %s1247_s13 }
 0x45f   : > { %p16_p5 = scmp.ge.s32.totalorder %s19_s17, 4   ;;  %s1697_s13 = smov %s1251_s14 }
 0x460   : > { %s1698_s14 = smov %s1354_s26  ;;  %s1699_s15 = smov %s1259_s16 }
 0x461   : > { %s1700_s16 = smov %s1702_s20  ;;  %18 = sbr.rel (!%p16_p5) target bundleno = 6 (0x6), region = 85 }
 0x468   :  { %858 = vsyncpa [#allocation5], 1 }
 0x469   :  { %860 = vsyncpa [#allocation5 + $0x1], 1 }
 0x46a   :  { %861 = vsyncpa [#allocation6], 1 }
 0x46b   :  { %863 = vsyncpa [#allocation6 + $0x1], 1 }

</bundles_post_ra>
